<compile_context>
chip_gen: v6e
topology: v6e:2x2x1
jax: 0.10.0
libtpu: 0.0.40
codegen_flags: <defaults>
</compile_context>

<pallas_src>
import jax
import jax.numpy as jnp
from jax import lax
from jax.experimental import pallas as pl
from jax.experimental.pallas import tpu as pltpu

EPS = 1e-5


def _subnet(x, w1t, gamma, beta, w2t, b2):
    """Linear (pre-BN bias dropped) -> BatchNorm1d(batch stats) -> ReLU -> Linear.

    Matmul operands are bf16 (f32 accumulation on the MXU); all BatchNorm /
    ReLU / residual math stays in f32.
    """
    h = jnp.dot(x.astype(jnp.bfloat16), w1t,
                preferred_element_type=jnp.float32)
    inv_n = 1.0 / h.shape[0]                          # static full batch size
    mean = jnp.sum(h, axis=0, keepdims=True) * inv_n
    hc = h - mean
    var = jnp.sum(hc * hc, axis=0, keepdims=True) * inv_n   # biased, centered
    scale = gamma * lax.rsqrt(var + EPS)              # rsqrt -> EUP slot
    hr = jnp.maximum(hc * scale + beta, 0.0)          # fused BN affine + ReLU
    return jnp.dot(hr.astype(jnp.bfloat16), w2t,
                   preferred_element_type=jnp.float32) + b2


def revblock_kernel(x1_ref, x2_ref, wf1_ref, wf2_ref, wg1_ref, wg2_ref,
                    vec_ref, y_ref):
    H = x1_ref.shape[1]
    x1 = x1_ref[...]                                  # (B, H) f32, DMA-split
    x2 = x2_ref[...]
    vec = vec_ref[...]                                # (6, H) packed f32

    y1 = x1 + _subnet(x2, wf1_ref[...], vec[0:1], vec[1:2],
                      wf2_ref[...], vec[2:3])
    y2 = x2 + _subnet(y1, wg1_ref[...], vec[3:4], vec[4:5],
                      wg2_ref[...], vec[5:6])

    # Two lane-dense, 128-aligned stores; no concat temp.
    y_ref[:, :H] = y1
    y_ref[:, H:] = y2


def prepare_params(params):
    """One-time preprocessing (off the per-forward path): pre-transpose +
    bf16-cast the Linear weights, drop the mathematically redundant pre-BN
    bias b1, and pack the remaining 6 per-feature vectors into one array."""
    pF, pG = params["F"], params["G"]

    def vecs(p):
        return jnp.stack([p["gamma"], p["beta"], p["b2"]], axis=0)

    return {
        "wf1t": pF["w1"].T.astype(jnp.bfloat16),
        "wf2t": pF["w2"].T.astype(jnp.bfloat16),
        "wg1t": pG["w1"].T.astype(jnp.bfloat16),
        "wg2t": pG["w2"].T.astype(jnp.bfloat16),
        "vec": jnp.concatenate([vecs(pF), vecs(pG)], axis=0).astype(jnp.float32),
    }


def _vmem_ceiling_bytes():
    # Per-generation VMEM capacity (v5e/v6e: 128 MiB, v7x: 64 MiB); use ~80%
    # of it instead of pinning the scoped limit at the physical cap.
    try:
        cap = pltpu.get_tpu_info().vmem_capacity_bytes
    except Exception:
        cap = 64 * 1024 * 1024
    return int(0.8 * cap)


def revblock_forward(x, prepped):
    """x: (B, D) float32, D even, D//2 a multiple of 128. Returns (B, D)."""
    B, D = x.shape
    H = D // 2
    if H % 128 != 0:
        # TODO(synk): for H not a multiple of 128, present x/y as (B, 2, H)
        #             views (free reshape) so each half stays lane-dense.
        raise NotImplementedError("optimized path requires H % 128 == 0")

    # Resident footprint: double-buffered input blocks, four bf16 weight
    # matrices, packed vectors, the (B, D) output block, and ~14 (B, H) f32
    # intermediates (h, h-mean, hr, bf16 casts, f/g, y1/y2, temporaries).
    bytes_resident = (2 * (2 * B * H + 6 * H) * 4
                      + 2 * 4 * H * H * 2
                      + 2 * B * D * 4
                      + 14 * B * H * 4)
    vmem_limit = min(_vmem_ceiling_bytes(),
                     max(32 * 1024 * 1024, 2 * bytes_resident))

    return pl.pallas_call(
        revblock_kernel,
        out_shape=jax.ShapeDtypeStruct((B, D), jnp.float32),
        grid=(1,),
        in_specs=[
            pl.BlockSpec((B, H), lambda i: (0, 0)),   # x1 half (DMA split)
            pl.BlockSpec((B, H), lambda i: (0, 1)),   # x2 half (DMA split)
            pl.BlockSpec((H, H), lambda i: (0, 0)),   # Wf1^T (bf16, resident)
            pl.BlockSpec((H, H), lambda i: (0, 0)),   # Wf2^T
            pl.BlockSpec((H, H), lambda i: (0, 0)),   # Wg1^T
            pl.BlockSpec((H, H), lambda i: (0, 0)),   # Wg2^T
            pl.BlockSpec((6, H), lambda i: (0, 0)),   # packed gamma/beta/b2
        ],
        out_specs=pl.BlockSpec((B, D), lambda i: (0, 0)),
        compiler_params=pltpu.CompilerParams(
            dimension_semantics=("arbitrary",),
            vmem_limit_bytes=vmem_limit),
    )(x, x, prepped["wf1t"], prepped["wf2t"],
      prepped["wg1t"], prepped["wg2t"], prepped["vec"])


# ---------------------------------------------------------------------------
# Pure-JAX f32 reference (matches the PyTorch module, b1 included) + init.
# ---------------------------------------------------------------------------

def _subnet_ref(x, p):
    h = x @ p["w1"].T + p["b1"]
    mean = jnp.mean(h, axis=0, keepdims=True)
    var = jnp.mean((h - mean) ** 2, axis=0, keepdims=True)   # biased variance
    hn = (h - mean) / jnp.sqrt(var + EPS) * p["gamma"] + p["beta"]
    hr = jnp.maximum(hn, 0.0)
    return hr @ p["w2"].T + p["b2"]


def revblock_ref(x, params):
    H = x.shape[1] // 2
    x1, x2 = x[:, :H], x[:, H:]
    y1 = x1 + _subnet_ref(x2, params["F"])
    y2 = x2 + _subnet_ref(y1, params["G"])
    return jnp.concatenate([y1, y2], axis=1)


def init_params(key, H):
    ks = jax.random.split(key, 8)
    scale = 1.0 / jnp.sqrt(H)

    def branch(k0, k1, k2, k3):
        return {
            "w1": jax.random.uniform(k0, (H, H), jnp.float32, -scale, scale),
            "b1": jax.random.uniform(k1, (H,), jnp.float32, -scale, scale),
            "gamma": jnp.ones((H,), jnp.float32),   # PyTorch BatchNorm1d init
            "beta": jnp.zeros((H,), jnp.float32),
            "w2": jax.random.uniform(k2, (H, H), jnp.float32, -scale, scale),
            "b2": jax.random.uniform(k3, (H,), jnp.float32, -scale, scale),
        }

    return {"F": branch(*ks[0:4]), "G": branch(*ks[4:8])}


if __name__ == "__main__":
    B, D = 8, 256            # input_dim == output_dim == 256, H == 128 (aligned)
    H = D // 2

    key = jax.random.PRNGKey(0)
    kx, kp = jax.random.split(key)
    x = jax.random.normal(kx, (B, D), jnp.float32)
    params = init_params(kp, H)
    prepped = prepare_params(params)      # one-time weight prep (off hot path)

    fwd = jax.jit(revblock_forward)
    y = jax.block_until_ready(fwd(x, prepped))

    y_ref = revblock_ref(x, params)
    assert y.shape == (B, D)
    # Tolerance loosened for bf16 MXU operands (BN / residual math stays f32).
    assert jnp.allclose(y, y_ref, atol=5e-2, rtol=5e-2), \
        float(jnp.max(jnp.abs(y - y_ref)))

    print("KERNEL_OK")
</pallas_src>

<mosaic_0001>
module attributes {stable_mosaic.version = 11 : i64} {
  func.func @revblock_kernel(%arg0: i32, %arg1: memref<8x128xf32, #tpu.memory_space<vmem>>, %arg2: memref<8x128xf32, #tpu.memory_space<vmem>>, %arg3: memref<128x128xbf16, #tpu.memory_space<vmem>>, %arg4: memref<128x128xbf16, #tpu.memory_space<vmem>>, %arg5: memref<128x128xbf16, #tpu.memory_space<vmem>>, %arg6: memref<128x128xbf16, #tpu.memory_space<vmem>>, %arg7: memref<6x128xf32, #tpu.memory_space<vmem>>, %arg8: memref<8x256xf32, #tpu.memory_space<vmem>>) attributes {dimension_semantics = [#tpu.dimension_semantics<arbitrary>], iteration_bounds = array<i64: 1>, scalar_prefetch = 0 : i64, scratch_operands = 0 : i64, tpu.core_type = #tpu.core_type<tc>, window_params = [{transform_indices = @transform_0, window_bounds = array<i64: 8, 128>}, {transform_indices = @transform_1, window_bounds = array<i64: 8, 128>}, {pipeline_mode = #tpu.pipeline_mode<synchronous>, transform_indices = @transform_2, window_bounds = array<i64: 128, 128>}, {pipeline_mode = #tpu.pipeline_mode<synchronous>, transform_indices = @transform_3, window_bounds = array<i64: 128, 128>}, {pipeline_mode = #tpu.pipeline_mode<synchronous>, transform_indices = @transform_4, window_bounds = array<i64: 128, 128>}, {pipeline_mode = #tpu.pipeline_mode<synchronous>, transform_indices = @transform_5, window_bounds = array<i64: 128, 128>}, {pipeline_mode = #tpu.pipeline_mode<synchronous>, transform_indices = @transform_6, window_bounds = array<i64: 6, 128>}, {pipeline_mode = #tpu.pipeline_mode<synchronous>, transform_indices = @transform_7, window_bounds = array<i64: 8, 256>}]} {
    %c0 = arith.constant 0 : index
    %c0_0 = arith.constant 0 : index
    %0 = vector.load %arg1[%c0, %c0_0] : memref<8x128xf32, #tpu.memory_space<vmem>>, vector<8x128xf32>
    %c0_1 = arith.constant 0 : index
    %c0_2 = arith.constant 0 : index
    %1 = vector.load %arg2[%c0_1, %c0_2] : memref<8x128xf32, #tpu.memory_space<vmem>>, vector<8x128xf32>
    %c0_3 = arith.constant 0 : index
    %c0_4 = arith.constant 0 : index
    %2 = vector.load %arg7[%c0_3, %c0_4] : memref<6x128xf32, #tpu.memory_space<vmem>>, vector<6x128xf32>
    %c0_5 = arith.constant 0 : index
    %c0_6 = arith.constant 0 : index
    %3 = vector.load %arg3[%c0_5, %c0_6] : memref<128x128xbf16, #tpu.memory_space<vmem>>, vector<128x128xbf16>
    %4 = vector.extract_strided_slice %2 {offsets = [0, 0], sizes = [1, 128], strides = [1, 1]} : vector<6x128xf32> to vector<1x128xf32>
    %5 = vector.extract_strided_slice %2 {offsets = [1, 0], sizes = [1, 128], strides = [1, 1]} : vector<6x128xf32> to vector<1x128xf32>
    %c0_7 = arith.constant 0 : index
    %c0_8 = arith.constant 0 : index
    %6 = vector.load %arg4[%c0_7, %c0_8] : memref<128x128xbf16, #tpu.memory_space<vmem>>, vector<128x128xbf16>
    %7 = vector.extract_strided_slice %2 {offsets = [2, 0], sizes = [1, 128], strides = [1, 1]} : vector<6x128xf32> to vector<1x128xf32>
    %8 = arith.truncf %1 : vector<8x128xf32> to vector<8x128xbf16>
    %cst = arith.constant dense<0.000000e+00> : vector<8x128xf32>
    %9 = tpu.matmul %8, %3, %cst {dimension_numbers = #tpu.dot_dimension_numbers<[1], [0], [0], [1], [0, 0, 1, 1], [], []>} : vector<8x128xbf16>, vector<128x128xbf16>, vector<8x128xf32> -> vector<8x128xf32>
    %cst_9 = arith.constant dense<0.000000e+00> : vector<128xf32>
    %10 = vector.multi_reduction <add>, %9, %cst_9 [0] : vector<8x128xf32> to vector<128xf32>
    %11 = vector.shape_cast %10 : vector<128xf32> to vector<1x128xf32>
    %cst_10 = arith.constant 1.250000e-01 : f32
    %12 = vector.broadcast %cst_10 : f32 to vector<1x128xf32>
    %13 = arith.mulf %11, %12 : vector<1x128xf32>
    %14 = vector.broadcast %13 : vector<1x128xf32> to vector<8x128xf32>
    %15 = arith.subf %9, %14 : vector<8x128xf32>
    %16 = arith.mulf %15, %15 : vector<8x128xf32>
    %cst_11 = arith.constant dense<0.000000e+00> : vector<128xf32>
    %17 = vector.multi_reduction <add>, %16, %cst_11 [0] : vector<8x128xf32> to vector<128xf32>
    %18 = vector.shape_cast %17 : vector<128xf32> to vector<1x128xf32>
    %cst_12 = arith.constant 1.250000e-01 : f32
    %19 = vector.broadcast %cst_12 : f32 to vector<1x128xf32>
    %20 = arith.mulf %18, %19 : vector<1x128xf32>
    %cst_13 = arith.constant 9.99999974E-6 : f32
    %21 = vector.broadcast %cst_13 : f32 to vector<1x128xf32>
    %22 = arith.addf %20, %21 : vector<1x128xf32>
    %23 = math.rsqrt %22 : vector<1x128xf32>
    %24 = arith.mulf %4, %23 : vector<1x128xf32>
    %25 = vector.broadcast %24 : vector<1x128xf32> to vector<8x128xf32>
    %26 = arith.mulf %15, %25 : vector<8x128xf32>
    %27 = vector.broadcast %5 : vector<1x128xf32> to vector<8x128xf32>
    %28 = arith.addf %26, %27 : vector<8x128xf32>
    %cst_14 = arith.constant 0.000000e+00 : f32
    %29 = vector.broadcast %cst_14 : f32 to vector<8x128xf32>
    %30 = arith.maximumf %28, %29 : vector<8x128xf32>
    %31 = arith.truncf %30 : vector<8x128xf32> to vector<8x128xbf16>
    %cst_15 = arith.constant dense<0.000000e+00> : vector<8x128xf32>
    %32 = tpu.matmul %31, %6, %cst_15 {dimension_numbers = #tpu.dot_dimension_numbers<[1], [0], [0], [1], [0, 0, 1, 1], [], []>} : vector<8x128xbf16>, vector<128x128xbf16>, vector<8x128xf32> -> vector<8x128xf32>
    %33 = vector.broadcast %7 : vector<1x128xf32> to vector<8x128xf32>
    %34 = arith.addf %32, %33 : vector<8x128xf32>
    %35 = arith.addf %0, %34 : vector<8x128xf32>
    %c0_16 = arith.constant 0 : index
    %c0_17 = arith.constant 0 : index
    %36 = vector.load %arg5[%c0_16, %c0_17] : memref<128x128xbf16, #tpu.memory_space<vmem>>, vector<128x128xbf16>
    %37 = vector.extract_strided_slice %2 {offsets = [3, 0], sizes = [1, 128], strides = [1, 1]} : vector<6x128xf32> to vector<1x128xf32>
    %38 = vector.extract_strided_slice %2 {offsets = [4, 0], sizes = [1, 128], strides = [1, 1]} : vector<6x128xf32> to vector<1x128xf32>
    %c0_18 = arith.constant 0 : index
    %c0_19 = arith.constant 0 : index
    %39 = vector.load %arg6[%c0_18, %c0_19] : memref<128x128xbf16, #tpu.memory_space<vmem>>, vector<128x128xbf16>
    %40 = vector.extract_strided_slice %2 {offsets = [5, 0], sizes = [1, 128], strides = [1, 1]} : vector<6x128xf32> to vector<1x128xf32>
    %41 = arith.truncf %35 : vector<8x128xf32> to vector<8x128xbf16>
    %cst_20 = arith.constant dense<0.000000e+00> : vector<8x128xf32>
    %42 = tpu.matmul %41, %36, %cst_20 {dimension_numbers = #tpu.dot_dimension_numbers<[1], [0], [0], [1], [0, 0, 1, 1], [], []>} : vector<8x128xbf16>, vector<128x128xbf16>, vector<8x128xf32> -> vector<8x128xf32>
    %cst_21 = arith.constant dense<0.000000e+00> : vector<128xf32>
    %43 = vector.multi_reduction <add>, %42, %cst_21 [0] : vector<8x128xf32> to vector<128xf32>
    %44 = vector.shape_cast %43 : vector<128xf32> to vector<1x128xf32>
    %cst_22 = arith.constant 1.250000e-01 : f32
    %45 = vector.broadcast %cst_22 : f32 to vector<1x128xf32>
    %46 = arith.mulf %44, %45 : vector<1x128xf32>
    %47 = vector.broadcast %46 : vector<1x128xf32> to vector<8x128xf32>
    %48 = arith.subf %42, %47 : vector<8x128xf32>
    %49 = arith.mulf %48, %48 : vector<8x128xf32>
    %cst_23 = arith.constant dense<0.000000e+00> : vector<128xf32>
    %50 = vector.multi_reduction <add>, %49, %cst_23 [0] : vector<8x128xf32> to vector<128xf32>
    %51 = vector.shape_cast %50 : vector<128xf32> to vector<1x128xf32>
    %cst_24 = arith.constant 1.250000e-01 : f32
    %52 = vector.broadcast %cst_24 : f32 to vector<1x128xf32>
    %53 = arith.mulf %51, %52 : vector<1x128xf32>
    %cst_25 = arith.constant 9.99999974E-6 : f32
    %54 = vector.broadcast %cst_25 : f32 to vector<1x128xf32>
    %55 = arith.addf %53, %54 : vector<1x128xf32>
    %56 = math.rsqrt %55 : vector<1x128xf32>
    %57 = arith.mulf %37, %56 : vector<1x128xf32>
    %58 = vector.broadcast %57 : vector<1x128xf32> to vector<8x128xf32>
    %59 = arith.mulf %48, %58 : vector<8x128xf32>
    %60 = vector.broadcast %38 : vector<1x128xf32> to vector<8x128xf32>
    %61 = arith.addf %59, %60 : vector<8x128xf32>
    %cst_26 = arith.constant 0.000000e+00 : f32
    %62 = vector.broadcast %cst_26 : f32 to vector<8x128xf32>
    %63 = arith.maximumf %61, %62 : vector<8x128xf32>
    %64 = arith.truncf %63 : vector<8x128xf32> to vector<8x128xbf16>
    %cst_27 = arith.constant dense<0.000000e+00> : vector<8x128xf32>
    %65 = tpu.matmul %64, %39, %cst_27 {dimension_numbers = #tpu.dot_dimension_numbers<[1], [0], [0], [1], [0, 0, 1, 1], [], []>} : vector<8x128xbf16>, vector<128x128xbf16>, vector<8x128xf32> -> vector<8x128xf32>
    %66 = vector.broadcast %40 : vector<1x128xf32> to vector<8x128xf32>
    %67 = arith.addf %65, %66 : vector<8x128xf32>
    %68 = arith.addf %1, %67 : vector<8x128xf32>
    %c0_28 = arith.constant 0 : index
    %c0_29 = arith.constant 0 : index
    %69 = vector.load %arg8[%c0_28, %c0_29] : memref<8x256xf32, #tpu.memory_space<vmem>>, vector<8x128xf32>
    tpu.vector_store %arg8[%c0_28, %c0_29], %35 {strides = array<i32>} : memref<8x256xf32, #tpu.memory_space<vmem>>, vector<8x128xf32>,
    %c0_30 = arith.constant 0 : index
    %c128 = arith.constant 128 : index
    %70 = vector.load %arg8[%c0_30, %c128] : memref<8x256xf32, #tpu.memory_space<vmem>>, vector<8x128xf32>
    tpu.vector_store %arg8[%c0_30, %c128], %68 {strides = array<i32>} : memref<8x256xf32, #tpu.memory_space<vmem>>, vector<8x128xf32>,
    return
  }
  func.func @transform_0(%arg0: i32) -> (i32, i32) {
    %c0_i32 = arith.constant 0 : i32
    %c0_i32_0 = arith.constant 0 : i32
    %c0_i32_1 = arith.constant 0 : i32
    return %c0_i32, %c0_i32_0 : i32, i32
  }
  func.func @transform_1(%arg0: i32) -> (i32, i32) {
    %c0_i32 = arith.constant 0 : i32
    %c1_i32 = arith.constant 1 : i32
    %c0_i32_0 = arith.constant 0 : i32
    return %c0_i32, %c1_i32 : i32, i32
  }
  func.func @transform_2(%arg0: i32) -> (i32, i32) {
    %c0_i32 = arith.constant 0 : i32
    %c0_i32_0 = arith.constant 0 : i32
    %c0_i32_1 = arith.constant 0 : i32
    return %c0_i32, %c0_i32_0 : i32, i32
  }
  func.func @transform_3(%arg0: i32) -> (i32, i32) {
    %c0_i32 = arith.constant 0 : i32
    %c0_i32_0 = arith.constant 0 : i32
    %c0_i32_1 = arith.constant 0 : i32
    return %c0_i32, %c0_i32_0 : i32, i32
  }
  func.func @transform_4(%arg0: i32) -> (i32, i32) {
    %c0_i32 = arith.constant 0 : i32
    %c0_i32_0 = arith.constant 0 : i32
    %c0_i32_1 = arith.constant 0 : i32
    return %c0_i32, %c0_i32_0 : i32, i32
  }
  func.func @transform_5(%arg0: i32) -> (i32, i32) {
    %c0_i32 = arith.constant 0 : i32
    %c0_i32_0 = arith.constant 0 : i32
    %c0_i32_1 = arith.constant 0 : i32
    return %c0_i32, %c0_i32_0 : i32, i32
  }
  func.func @transform_6(%arg0: i32) -> (i32, i32) {
    %c0_i32 = arith.constant 0 : i32
    %c0_i32_0 = arith.constant 0 : i32
    %c0_i32_1 = arith.constant 0 : i32
    return %c0_i32, %c0_i32_0 : i32, i32
  }
  func.func @transform_7(%arg0: i32) -> (i32, i32) {
    %c0_i32 = arith.constant 0 : i32
    %c0_i32_0 = arith.constant 0 : i32
    %c0_i32_1 = arith.constant 0 : i32
    return %c0_i32, %c0_i32_0 : i32, i32
  }
}

</mosaic_0001>

<bundles_post_ra>
// kernel: revblock_forward.1
= control target key start
LH: loop header
LB: loop body
LE: loop exit
PB: predicated region body
PF: predicated region fallthrough
CT: control target
= control target key end

     0   :  { %12 = vsyncpa [#allocation3], 0  ;;  %s1149_s0 = inlined_call_operand.hbm [shape: f32[8,256], index: 0, kind: input, shape index: {}, may-alias: {0,1}]   ;;  %s1150_s1 = inlined_call_operand.hbm [shape: f32[8,256], index: 1, kind: input, shape index: {}, may-alias: {0,1}]   ;;  %s1151_s2 = inlined_call_operand.hbm [shape: bf16[128,128], index: 2, kind: input, shape index: {}]   ;;  %s1152_s3 = inlined_call_operand.hbm [shape: bf16[128,128], index: 3, kind: input, shape index: {}]   ;;  %s1153_s4 = inlined_call_operand.hbm [shape: bf16[128,128], index: 4, kind: input, shape index: {}]   ;;  %s1154_s5 = inlined_call_operand.hbm [shape: bf16[128,128], index: 5, kind: input, shape index: {}]   ;;  %s1155_s6 = inlined_call_operand.hbm [shape: f32[6,128], index: 6, kind: input, shape index: {}]   ;;  %s1156_s7 = inlined_call_operand.hbm [shape: f32[8,256], index: 7, kind: output, shape index: {}]  }
   0x1   :  { %13 = vsyncpa [#allocation6], 0 }
   0x2   :  { %14 = vsyncpa [#allocation9], 0 }
   0x3   :  { %15 = vsyncpa [#allocation12], 0  ;;  %s32_s26 = scalar_lea.hbm %s1150_s1, 128 }
   0x4   :  { %16 = vsyncpa [#allocation4], 0  ;;  %s1000_s27 = smov [#allocation5]  }
   0x5   :  { %s34_s28 = sshll.u32 %s1000_s27, 4  ;;  %s35_s28 = int_to_ptr.vmem [resolvable:$true] %s34_s28 }
   0x6   :  { %s837_s29 = scalar_lea.vmem %s35_s28, 128  ;;  %p842_p1 = scmp.lt.s32.totalorder %s35_s28, %s35_s28 }
   0x7   :  { %p838_p0 = scmp.ne.s32.totalorder %s35_s28, %s837_s29  ;;  %p843_p2 = scmp.lt.s32.totalorder %s837_s29, %s837_s29 }
   0x9   :  { %p844_p3 = por %p843_p2, %p842_p1 }
   0xb   :  { %p845_p4 = pnand %p844_p3, %p838_p0 }
   0xd   :  { %848 = shalt.err (!%p845_p4)
}
   0xe   :  { %37 = dma.hbm_to_vmem [thread:$0]  %s32_s26, 128, %s35_s28, [#allocation6]  }
   0xf   :  { %s1001_s30 = smov [#allocation8]   ;;  %s1002_s9 = smov [#allocation11]  }
  0x10   :  { %s55_s8 = sshll.u32 %s1001_s30, 4  ;;  %s79_s10 = sshll.u32 %s1002_s9, 4  ;;  %s56_s8 = int_to_ptr.vmem [resolvable:$true] %s55_s8  ;;  %s80_s10 = int_to_ptr.vmem [resolvable:$true] %s79_s10 }
  0x11   :  { %s858_s11 = scalar_lea.vmem %s56_s8, 1024  ;;  %p863_p6 = scmp.lt.s32.totalorder %s56_s8, %s56_s8 }
  0x12   :  { %p859_p5 = scmp.ne.s32.totalorder %s56_s8, %s858_s11  ;;  %p864_p7 = scmp.lt.s32.totalorder %s858_s11, %s858_s11 }
  0x14   :  { %p865_p8 = por %p864_p7, %p863_p6 }
  0x16   :  { %p866_p9 = pnand %p865_p8, %p859_p5 }
  0x18   :  { %869 = shalt.err (!%p866_p9)
}
  0x19   :  { %s1003_s1 = smov 64   ;;  %s1004_s12 = smov 4  }
  0x1a   :  { %61 = dma.hbm_to_vmem [thread:$0]  %s1152_s3, 1024, %s56_s8, [#allocation9], %s1003_s1, %s1003_s1, %s1004_s12  }
  0x1b   :  { %s878_s15 = scalar_lea.vmem %s80_s10, 1024  ;;  %p883_p11 = scmp.lt.s32.totalorder %s80_s10, %s80_s10 }
  0x1c   :  { %p879_p10 = scmp.ne.s32.totalorder %s80_s10, %s878_s15  ;;  %p884_p12 = scmp.lt.s32.totalorder %s878_s15, %s878_s15 }
  0x1e   :  { %p885_p13 = por %p884_p12, %p883_p11 }
  0x20   :  { %p886_p0 = pnand %p885_p13, %p879_p10 }
  0x22   :  { %889 = shalt.err (!%p886_p0)
}
  0x23   :  { %85 = dma.hbm_to_vmem [thread:$0]  %s1154_s5, 1024, %s80_s10, [#allocation12], %s1003_s1, %s1003_s1, %s1004_s12  }
  0x24   :  { %s1005_s18 = smov [#allocation2]   ;;  %s1006_s20 = smov [#allocation7]  }
  0x25   :  { %s23_s19 = sshll.u32 %s1005_s18, 4  ;;  %s43_s21 = sshll.u32 %s1006_s20, 4  ;;  %s24_s19 = int_to_ptr.vmem [resolvable:$true] %s23_s19  ;;  %s44_s21 = int_to_ptr.vmem [resolvable:$true] %s43_s21 }
  0x26   :  { %s898_s3 = scalar_lea.vmem %s24_s19, 128  ;;  %p903_p2 = scmp.lt.s32.totalorder %s24_s19, %s24_s19 }
  0x27   :  { %p899_p1 = scmp.ne.s32.totalorder %s24_s19, %s898_s3  ;;  %p904_p3 = scmp.lt.s32.totalorder %s898_s3, %s898_s3 }
  0x29   :  { %p905_p4 = por %p904_p3, %p903_p2 }
  0x2b   :  { %p906_p5 = pnand %p905_p4, %p899_p1 }
  0x2d   :  { %909 = shalt.err (!%p906_p5)
}
  0x2e   :  { %26 = dma.hbm_to_vmem [thread:$0]  %s1149_s0, 128, %s24_s19, [#allocation3]  }
  0x2f   :  { %s918_s24 = scalar_lea.vmem %s44_s21, 1024  ;;  %p923_p7 = scmp.lt.s32.totalorder %s44_s21, %s44_s21 }
  0x30   :  { %p919_p6 = scmp.ne.s32.totalorder %s44_s21, %s918_s24  ;;  %p924_p8 = scmp.lt.s32.totalorder %s918_s24, %s918_s24 }
  0x32   :  { %p925_p9 = por %p924_p8, %p923_p7 }
  0x34   :  { %p926_p10 = pnand %p925_p9, %p919_p6 }
  0x36   :  { %929 = shalt.err (!%p926_p10)
}
  0x37   :  { %49 = dma.hbm_to_vmem [thread:$0]  %s1151_s2, 1024, %s44_s21, [#allocation6], %s1003_s1, %s1003_s1, %s1004_s12  }
  0x38   :  { %s1007_s26 = smov [#allocation10]   ;;  %s1008_s28 = smov [#allocation13]  }
  0x39   :  { %s67_s27 = sshll.u32 %s1007_s26, 4  ;;  %s92_s29 = sshll.u32 %s1008_s28, 4  ;;  %s68_s27 = int_to_ptr.vmem [resolvable:$true] %s67_s27  ;;  %s93_s29 = int_to_ptr.vmem [resolvable:$true] %s92_s29 }
  0x3a   :  { %s938_s0 = scalar_lea.vmem %s68_s27, 1024  ;;  %p943_p12 = scmp.lt.s32.totalorder %s68_s27, %s68_s27 }
  0x3b   :  { %p939_p11 = scmp.ne.s32.totalorder %s68_s27, %s938_s0  ;;  %p944_p13 = scmp.lt.s32.totalorder %s938_s0, %s938_s0 }
  0x3d   :  { %p945_p0 = por %p944_p13, %p943_p12 }
  0x3f   :  { %p946_p1 = pnand %p945_p0, %p939_p11 }
  0x41   :  { %949 = shalt.err (!%p946_p1)
}
  0x42   :  { %73 = dma.hbm_to_vmem [thread:$0]  %s1153_s4, 1024, %s68_s27, [#allocation9], %s1003_s1, %s1003_s1, %s1004_s12  }
  0x43   :  { %s958_s2 = scalar_lea.vmem %s93_s29, 128  ;;  %p963_p3 = scmp.lt.s32.totalorder %s93_s29, %s93_s29 }
  0x44   :  { %p959_p2 = scmp.ne.s32.totalorder %s93_s29, %s958_s2  ;;  %p964_p4 = scmp.lt.s32.totalorder %s958_s2, %s958_s2 }
  0x46   :  { %p965_p5 = por %p964_p4, %p963_p3 }
  0x48   :  { %p966_p6 = pnand %p965_p5, %p959_p2 }
  0x4a   :  { %969 = shalt.err (!%p966_p6)
}
  0x4b   :  { %95 = dma.hbm_to_vmem [thread:$0]  %s1155_s6, 128, %s93_s29, [#allocation12]  }
  0x4c   :  { %990 = dma.done.wait [#allocation3], 128  }
  0x4d   :  { %991 = vsyncadd [#allocation3], 4294967168 }
  0x4e   :  { %992 = dma.done.wait [#allocation6], 1152  }
  0x4f   :  { %993 = vsyncadd [#allocation6], 4294966144 }
  0x50   :  { %994 = dma.done.wait [#allocation9], 2048  }
  0x51   :  { %995 = vsyncadd [#allocation9], 4294965248 }
  0x52   :  { %996 = dma.done.wait [#allocation12], 1152  }
  0x53   :  { %997 = vsyncadd [#allocation12], 4294966144  ;;  %v1009_v0 = vmov 0.0   ;;  %vm1010_vm0 = vmmov 0   ;;  %v791_v1 = vld [vmem:[#allocation7 + $0x38] sm:$0xff]   ;;  %v792_v2 = vld [vmem:[#allocation7 + $0x30] sm:$0xff]   ;;  %v261_v46 = vlaneseq }
  0x54   :  { %699 = vmatprep.subr.bf16.mxu0 %v1009_v0  ;;  %715 = vmatprep.mubr.msk.bf16.mxu0 %vm1010_vm0, %v1009_v0  ;;  %v793_v3 = vld [vmem:[#allocation7 + $0x28] sm:$0xff]   ;;  %v794_v4 = vld [vmem:[#allocation7 + $0x20] sm:$0xff]   ;;  %v795_v5 = vld [vmem:[#allocation7 + $0x18] sm:$0xff]   ;;  %s1011_s4 = smov [#allocation14]  }
  0x55   :  { %719 = vmatprep.subr.bf16.mxu1 %v1009_v0  ;;  %735 = vmatprep.mubr.msk.bf16.mxu1 %vm1010_vm0, %v1009_v0  ;;  %v796_v6 = vld [vmem:[#allocation7 + $0x10] sm:$0xff]   ;;  %v797_v7 = vld [vmem:[#allocation7 + $0x8] sm:$0xff]   ;;  %v798_v8 = vld [vmem:[#allocation7] sm:$0xff]   ;;  %v1119_v47 = vshrl.u32 %v261_v46, 7  ;;  %s619_s6 = sshll.u32 %s1011_s4, 4  ;;  %s620_s6 = int_to_ptr.vmem [resolvable:$true] %s619_s6 }
  0x56   :  { %700 = vmatpush3.bf16.msra.mxu0 %v791_v1  ;;  %v1097_v9 = vld [vmem:[#allocation5] sm:$0xff]  ;;  %v800_v12 = vld [vmem:[#allocation8 + $0x30] sm:$0xff]   ;;  %v801_v13 = vld [vmem:[#allocation8 + $0x28] sm:$0xff]   ;;  %s970_s11 = scalar_lea.vmem %s620_s6, 256  ;;  %p975_p8 = scmp.lt.s32.totalorder %s620_s6, %s620_s6 }
  0x57   :  { %701 = vmatprep.subr.bf16.mxu0 %v1009_v0  ;;  %v153_v10 = vpack.c.bf16 %v1097_v9, %v1097_v9  ;;  %v799_v11 = vld [vmem:[#allocation8 + $0x38] sm:$0xff]   ;;  %v802_v14 = vld [vmem:[#allocation8 + $0x20] sm:$0xff]   ;;  %v804_v16 = vld [vmem:[#allocation8 + $0x10] sm:$0xff]   ;;  %v263_v49 = vsub.s32 0, %v1119_v47  ;;  %v268_v50 = vsub.s32 1, %v1119_v47  ;;  %v275_v61 = vsub.s32 2, %v1119_v47  ;;  %p971_p7 = scmp.ne.s32.totalorder %s620_s6, %s970_s11  ;;  %p976_p9 = scmp.lt.s32.totalorder %s970_s11, %s970_s11 }
  0x58   :  { %720 = vmatpush3.bf16.msra.mxu1 %v799_v11  ;;  %v803_v15 = vld [vmem:[#allocation8 + $0x18] sm:$0xff]   ;;  %v805_v17 = vld [vmem:[#allocation8 + $0x8] sm:$0xff]   ;;  %v806_v18 = vld [vmem:[#allocation8] sm:$0xff]  }
  0x59   :  { %721 = vmatprep.subr.bf16.mxu1 %v1009_v0  ;;  %v807_v19 = vld [vmem:[#allocation10 + $0x38] sm:$0xff]   ;;  %v808_v20 = vld [vmem:[#allocation10 + $0x30] sm:$0xff]   ;;  %v809_v21 = vld [vmem:[#allocation10 + $0x28] sm:$0xff]   ;;  %p977_p10 = por %p976_p9, %p975_p8 }
  0x5a   :  { %702 = vmatpush3.bf16.msra.mxu0 %v792_v2  ;;  %v810_v22 = vld [vmem:[#allocation10 + $0x20] sm:$0xff]   ;;  %v811_v23 = vld [vmem:[#allocation10 + $0x18] sm:$0xff]   ;;  %v812_v24 = vld [vmem:[#allocation10 + $0x10] sm:$0xff]  }
  0x5b   :  { %703 = vmatprep.subr.bf16.mxu0 %v1009_v0  ;;  %v1121_v48 = vld [vmem:[#allocation13] sm:$0x3f]  ;;  %v813_v59 = vld [vmem:[#allocation10 + $0x8] sm:$0xff]   ;;  %v118_v63 = vld [vmem:[#allocation2] sm:$0xff]  ;;  %p978_p11 = pnand %p977_p10, %p971_p7 }
  0x5c   :  { %722 = vmatpush3.bf16.msra.mxu1 %v800_v12  ;;  %v269_v54 = vrot.slane %v1121_v48, %v268_v50  ;;  %v814_v60 = vld [vmem:[#allocation10] sm:$0xff]   ;;  %v276_v62 = vrot.slane %v1121_v48, %v275_v61  ;;  %v817_v11 = vld [vmem:[#allocation11 + $0x28] sm:$0xff]  }
  0x5d   :  { %723 = vmatprep.subr.bf16.mxu1 %v1009_v0  ;;  %v818_v12 = vld [vmem:[#allocation11 + $0x20] sm:$0xff]  }
  0x5e   :  { %704 = vmatpush3.bf16.msra.mxu0 %v793_v3 }
  0x5f   :  { %705 = vmatprep.subr.bf16.mxu0 %v1009_v0 }
  0x60   :  { %724 = vmatpush3.bf16.msra.mxu1 %v801_v13  ;;  %v819_v13 = vld [vmem:[#allocation11 + $0x18] sm:$0xff]  }
  0x61   :  { %725 = vmatprep.subr.bf16.mxu1 %v1009_v0 }
  0x62   :  { %706 = vmatpush3.bf16.msra.mxu0 %v794_v4 }
  0x63   :  { %707 = vmatprep.subr.bf16.mxu0 %v1009_v0 }
  0x64   :  { %726 = vmatpush3.bf16.msra.mxu1 %v802_v14  ;;  %v820_v14 = vld [vmem:[#allocation11 + $0x10] sm:$0xff]  }
  0x65   :  { %727 = vmatprep.subr.bf16.mxu1 %v1009_v0 }
  0x66   :  { %708 = vmatpush3.bf16.msra.mxu0 %v795_v5 }
  0x67   :  { %709 = vmatprep.subr.bf16.mxu0 %v1009_v0 }
  0x68   :  { %728 = vmatpush3.bf16.msra.mxu1 %v803_v15  ;;  %v821_v15 = vld [vmem:[#allocation11 + $0x8] sm:$0xff]  }
  0x69   :  { %729 = vmatprep.subr.bf16.mxu1 %v1009_v0 }
  0x6a   :  { %710 = vmatpush3.bf16.msra.mxu0 %v796_v6 }
  0x6b   :  { %711 = vmatprep.subr.bf16.mxu0 %v1009_v0 }
  0x6c   :  { %730 = vmatpush3.bf16.msra.mxu1 %v804_v16  ;;  %v822_v16 = vld [vmem:[#allocation11] sm:$0xff]  }
  0x6d   :  { %731 = vmatprep.subr.bf16.mxu1 %v1009_v0 }
  0x6e   :  { %712 = vmatpush3.bf16.msra.mxu0 %v797_v7 }
  0x6f   :  { %713 = vmatprep.subr.bf16.mxu0 %v1009_v0 }
  0x70   :  { %732 = vmatpush3.bf16.msra.mxu1 %v805_v17 }
  0x71   :  { %733 = vmatprep.subr.bf16.mxu1 %v1009_v0 }
  0x72   :  { %714 = vmatpush3.bf16.msra.mxu0 %v798_v8  ;;  %v815_v8 = vld [vmem:[#allocation11 + $0x38] sm:$0xff]  }
  0x73   :  { %739 = vmatprep.subr.bf16.mxu0 %v1009_v0 }
  0x74   :  { %734 = vmatpush3.bf16.msra.mxu1 %v806_v18 }
  0x75   :  { %716 = vmatmul.mubr.bf16.vlgmr.msra.gmra.mxu0 %v153_v10  ;;  %759 = vmatprep.subr.bf16.mxu1 %v1009_v0  ;;  %v816_v10 = vld [vmem:[#allocation11 + $0x30] sm:$0xff]  }
  0x76   :  { %755 = vmatprep.mubr.msk.bf16.mxu0 %vm1010_vm0, %v1009_v0  ;;  %740 = vmatpush3.bf16.msra.mxu0 %v807_v19 }
  0x77   :  { %741 = vmatprep.subr.bf16.mxu0 %v1009_v0 }
  0x7a   :  { %742 = vmatpush3.bf16.msra.mxu0 %v808_v20 }
  0x7b   :  { %743 = vmatprep.subr.bf16.mxu0 %v1009_v0 }
  0x7e   :  { %744 = vmatpush3.bf16.msra.mxu0 %v809_v21 }
  0x7f   :  { %745 = vmatprep.subr.bf16.mxu0 %v1009_v0 }
  0x82   :  { %746 = vmatpush3.bf16.msra.mxu0 %v810_v22 }
  0x83   :  { %747 = vmatprep.subr.bf16.mxu0 %v1009_v0 }
  0x86   :  { %748 = vmatpush3.bf16.msra.mxu0 %v811_v23 }
  0x87   :  { %749 = vmatprep.subr.bf16.mxu0 %v1009_v0 }
  0x8a   :  { %750 = vmatpush3.bf16.msra.mxu0 %v812_v24 }
  0x8b   :  { %751 = vmatprep.subr.bf16.mxu0 %v1009_v0 }
  0x8e   :  { %752 = vmatpush3.bf16.msra.mxu0 %v813_v59 }
  0x8f   :  { %753 = vmatprep.subr.bf16.mxu0 %v1009_v0 }
  0x92   :  { %754 = vmatpush3.bf16.msra.mxu0 %v814_v60 }
 0x135   :  { %v236_v25 = vpop.f32.mrf.mxu0 }
 0x136   :  { %v242_v26 = vrot.slane %v236_v25, 4 }
 0x137   :  { %v717_v27 = vpop.f32.mrf.mxu0 }
 0x138   :  { %v243_v28 = vadd.f32 %v242_v26, %v236_v25 }
 0x139   :  { %v239_v29 = vpop.f32.mrf.mxu0 }
 0x13a   :  { %v244_v30 = vrot.slane %v243_v28, 2 }
 0x13b   :  { %v718_v31 = vpop.f32.mrf.mxu0 }
 0x13c   :  { %v245_v32 = vadd.f32 %v244_v30, %v243_v28 }
 0x13e   :  { %v246_v33 = vrot.slane %v245_v32, 1 }
 0x140   :  { %v247_v34 = vadd.f32 %v246_v33, %v245_v32 }
 0x142   :  { %v248_v35 = vmul.f32 0.125, %v247_v34 }
 0x144   :  { %v249_v36 = vsub.f32 %v236_v25, %v248_v35 }
 0x146   :  { %v250_v37 = vmul.f32 %v249_v36, %v249_v36 }
 0x148   :  { %v251_v38 = vrot.slane %v250_v37, 4 }
 0x14a   :  { %v252_v39 = vadd.f32 %v251_v38, %v250_v37  ;;  %v508_v37 = vsub.s32 3, %v1119_v47  ;;  %v513_v38 = vsub.s32 4, %v1119_v47 }
 0x14c   :  { %v253_v40 = vrot.slane %v252_v39, 2 }
 0x14e   :  { %v254_v41 = vadd.f32 %v253_v40, %v252_v39 }
 0x150   :  { %v255_v42 = vrot.slane %v254_v41, 1 }
 0x152   :  { %v256_v43 = vadd.f32 %v255_v42, %v254_v41  ;;  %v514_v42 = vrot.slane %v1121_v48, %v513_v38 }
 0x154   :  { %v257_v44 = vmul.f32 0.125, %v256_v43 }
 0x156   :  { %v258_v45 = vadd.f32 1e-05, %v257_v44 }
 0x158   :  { %823 = vrsqrt.f32 %v258_v45 }
 0x165   :  { %v824_v51 = vpop.eup %823 }
 0x166   :  { %v260_v52 = vmul.f32 %v824_v51, %v1121_v48 }
 0x168   :  { %v264_v53 = vrot.slane %v260_v52, %v263_v49  ;;  %v520_v49 = vsub.s32 5, %v1119_v47 }
 0x16a   :  { %v265_v55 = vmul.f32 %v264_v53, %v249_v36  ;;  %v521_v50 = vrot.slane %v1121_v48, %v520_v49 }
 0x16c   :  { %v270_v56 = vadd.f32 %v269_v54, %v265_v55 }
 0x16e   :  { %v271_v57 = vmax.f32 %v270_v56, 0.0 }
 0x170   :  { %v272_v58 = vpack.c.bf16 %v271_v57, %v271_v57 }
 0x172   :  { %736 = vmatmul.mubr.bf16.vlgmr.msra.gmra.mxu1 %v272_v58 }
 0x173   :  { %775 = vmatprep.mubr.msk.bf16.mxu1 %vm1010_vm0, %v1009_v0  ;;  %760 = vmatpush3.bf16.msra.mxu1 %v815_v8 }
 0x174   :  { %761 = vmatprep.subr.bf16.mxu1 %v1009_v0 }
 0x177   :  { %762 = vmatpush3.bf16.msra.mxu1 %v816_v10 }
 0x178   :  { %763 = vmatprep.subr.bf16.mxu1 %v1009_v0 }
 0x17b   :  { %764 = vmatpush3.bf16.msra.mxu1 %v817_v11 }
 0x17c   :  { %765 = vmatprep.subr.bf16.mxu1 %v1009_v0 }
 0x17f   :  { %766 = vmatpush3.bf16.msra.mxu1 %v818_v12 }
 0x180   :  { %767 = vmatprep.subr.bf16.mxu1 %v1009_v0 }
 0x183   :  { %768 = vmatpush3.bf16.msra.mxu1 %v819_v13 }
 0x184   :  { %769 = vmatprep.subr.bf16.mxu1 %v1009_v0 }
 0x187   :  { %770 = vmatpush3.bf16.msra.mxu1 %v820_v14 }
 0x188   :  { %771 = vmatprep.subr.bf16.mxu1 %v1009_v0 }
 0x18b   :  { %772 = vmatpush3.bf16.msra.mxu1 %v821_v15 }
 0x18c   :  { %773 = vmatprep.subr.bf16.mxu1 %v1009_v0 }
 0x18f   :  { %774 = vmatpush3.bf16.msra.mxu1 %v822_v16 }
 0x232   :  { %v359_v1 = vpop.f32.mrf.mxu1 }
 0x233   :  { %v360_v2 = vadd.f32 %v359_v1, %v276_v62 }
 0x234   :  { %v737_v3 = vpop.f32.mrf.mxu1 }
 0x235   :  { %v365_v4 = vadd.f32 %v360_v2, %v118_v63 }
 0x236   :  { %v362_v5 = vpop.f32.mrf.mxu1 }
 0x237   :  { %v398_v6 = vpack.c.bf16 %v365_v4, %v365_v4  ;;  %611 = vst [vmem:[#allocation14] sm:$0xff] %v365_v4 }
 0x238   :  { %v738_v7 = vpop.f32.mrf.mxu1 }
 0x239   :  { %756 = vmatmul.mubr.bf16.vlgmr.msra.gmra.mxu0 %v398_v6 }
 0x2f9   :  { %v481_v17 = vpop.f32.mrf.mxu0 }
 0x2fa   :  { %v487_v18 = vrot.slane %v481_v17, 4 }
 0x2fb   :  { %v757_v19 = vpop.f32.mrf.mxu0 }
 0x2fc   :  { %v488_v20 = vadd.f32 %v487_v18, %v481_v17 }
 0x2fd   :  { %v484_v21 = vpop.f32.mrf.mxu0 }
 0x2fe   :  { %v489_v22 = vrot.slane %v488_v20, 2 }
 0x2ff   :  { %v758_v23 = vpop.f32.mrf.mxu0 }
 0x300   :  { %v490_v24 = vadd.f32 %v489_v22, %v488_v20 }
 0x302   :  { %v491_v25 = vrot.slane %v490_v24, 1 }
 0x304   :  { %v492_v26 = vadd.f32 %v491_v25, %v490_v24 }
 0x306   :  { %v493_v27 = vmul.f32 0.125, %v492_v26 }
 0x308   :  { %v494_v28 = vsub.f32 %v481_v17, %v493_v27 }
 0x30a   :  { %v495_v29 = vmul.f32 %v494_v28, %v494_v28 }
 0x30c   :  { %v496_v30 = vrot.slane %v495_v29, 4 }
 0x30e   :  { %v497_v31 = vadd.f32 %v496_v30, %v495_v29 }
 0x310   :  { %v498_v32 = vrot.slane %v497_v31, 2 }
 0x312   :  { %v499_v33 = vadd.f32 %v498_v32, %v497_v31 }
 0x314   :  { %v500_v0 = vrot.slane %v499_v33, 1 }
 0x316   :  { %v501_v34 = vadd.f32 %v500_v0, %v499_v33 }
 0x318   :  { %v502_v35 = vmul.f32 0.125, %v501_v34 }
 0x31a   :  { %v503_v36 = vadd.f32 1e-05, %v502_v35 }
 0x31c   :  { %825 = vrsqrt.f32 %v503_v36 }
 0x329   :  { %v826_v39 = vpop.eup %825 }
 0x32a   :  { %v505_v40 = vmul.f32 %v826_v39, %v1121_v48 }
 0x32c   :  { %v509_v41 = vrot.slane %v505_v40, %v508_v37 }
 0x32e   :  { %v510_v43 = vmul.f32 %v509_v41, %v494_v28 }
 0x330   :  { %v515_v44 = vadd.f32 %v514_v42, %v510_v43 }
 0x332   :  { %v516_v45 = vmax.f32 %v515_v44, 0.0 }
 0x334   :  { %v517_v46 = vpack.c.bf16 %v516_v45, %v516_v45 }
 0x336   :  { %776 = vmatmul.mubr.bf16.vlgmr.msra.gmra.mxu1 %v517_v46 }
 0x3f6   :  { %v604_v51 = vpop.f32.mrf.mxu1 }
 0x3f7   :  { %v605_v52 = vadd.f32 %v604_v51, %v521_v50 }
 0x3f8   :  { %v777_v53 = vpop.f32.mrf.mxu1 }
 0x3f9   :  { %v610_v54 = vadd.f32 %v605_v52, %v1097_v9 }
 0x3fa   :  { %v607_v55 = vpop.f32.mrf.mxu1 }
 0x3fb   :  { %612 = vst [vmem:[#allocation14 + $0x8] sm:$0xff] %v610_v54 }
 0x3fc   :  { %v778_v56 = vpop.f32.mrf.mxu1 }
 0x3fd   :  { %981 = shalt.err (!%p978_p11)
}
 0x3fe   :  { %622 = dma.vmem_to_hbm [thread:$0]  %s620_s6, 256, %s1156_s7, [#allocation4]  }
 0x3ff   :  { %998 = dma.done.wait [#allocation4], 256  }
 0x400   :  { %999 = vsyncadd [#allocation4], 4294967040 }
 0x401   :  { %626 = vsyncpa [#allocation3], 1 }
 0x402   :  { %627 = vsyncpa [#allocation6], 1 }
 0x403   :  { %628 = vsyncpa [#allocation9], 1 }
 0x404   :  { %629 = vsyncpa [#allocation12], 1 }
 0x405   :  { %630 = vsyncpa [#allocation4], 1 }

</bundles_post_ra>
